<compile_context>
chip_gen: v7x
topology: tpu7x:2x2x1
jax: 0.10.0
libtpu: 0.0.40
codegen_flags: <defaults>
</compile_context>

<pallas_src>
import jax
import jax.numpy as jnp
from jax import lax
from jax.experimental import pallas as pl
from jax.experimental.pallas import tpu as pltpu

IN_FEATURES = 5000
OUT_FEATURES = 2
DEFAULT_TILE_B = 512  # sweep 256/512/1024 per chip if needed


def _logreg_kernel(x_ref, w_ref, b_ref, o_ref):
    # x: [TB, F]   w: [OUT, F] (PyTorch Linear layout, lane-dense)   b: [1, OUT]
    x = x_ref[...]
    w = w_ref[...]
    b = b_ref[...]
    # logits = x @ w.T + b  (contract feature axis of both operands, f32 acc on MXU)
    logits = lax.dot_general(
        x, w,
        dimension_numbers=(((1,), (1,)), ((), ())),
        preferred_element_type=jnp.float32,
    ) + b
    o_ref[...] = jax.nn.sigmoid(logits).astype(o_ref.dtype)


def _round_up(n, m):
    return ((n + m - 1) // m) * m


def logistic_regression(x, w, b, *, tile_b: int = DEFAULT_TILE_B):
    """sigmoid(x @ w.T + b).

    x: [B, 5000] f32
    w: [2, 5000] f32  (PyTorch nn.Linear weight layout)
    b: [2] f32
    returns: [B, 2] f32
    """
    B = x.shape[0]
    assert x.shape[1] == IN_FEATURES
    assert w.shape == (OUT_FEATURES, IN_FEATURES)
    assert tile_b % 8 == 0

    # Choose the number of batch tiles from the cap, then the smallest
    # sublane-aligned tile that covers B -> minimal zero-padding / HBM waste.
    num_tiles = pl.cdiv(B, tile_b)
    tb = _round_up(-(-B // num_tiles), 8)     # ceil(B / num_tiles), 8-aligned
    b_pad = tb * num_tiles
    if b_pad != B:
        x = jnp.pad(x, ((0, b_pad - B), (0, 0)))
    grid = (num_tiles,)

    b2 = b.reshape(1, OUT_FEATURES).astype(jnp.float32)

    cost = pl.CostEstimate(
        flops=2 * b_pad * IN_FEATURES * OUT_FEATURES,
        transcendentals=b_pad * OUT_FEATURES,
        bytes_accessed=(b_pad * IN_FEATURES * 4
                        + OUT_FEATURES * IN_FEATURES * 4
                        + b_pad * OUT_FEATURES * 4),
    )

    out = pl.pallas_call(
        _logreg_kernel,
        out_shape=jax.ShapeDtypeStruct((b_pad, OUT_FEATURES), jnp.float32),
        grid_spec=pltpu.PrefetchScalarGridSpec(
            num_scalar_prefetch=0,
            grid=grid,
            in_specs=[
                # x: one batch tile per grid step (auto double-buffered)
                pl.BlockSpec((tb, IN_FEATURES), lambda i: (i, 0)),
                # weight + bias: constant index_map -> fetched once, stay resident
                pl.BlockSpec((OUT_FEATURES, IN_FEATURES), lambda i: (0, 0)),
                pl.BlockSpec((1, OUT_FEATURES), lambda i: (0, 0)),
            ],
            out_specs=pl.BlockSpec((tb, OUT_FEATURES), lambda i: (i, 0)),
        ),
        compiler_params=pltpu.CompilerParams(
            dimension_semantics=("parallel",),   # independent batch tiles (v7x 2 TCs)
            vmem_limit_bytes=48 << 20,           # fits v5e/v6e/v7x with TB<=512
        ),
        cost_estimate=cost,
    )(x, w, b2)

    return out[:B] if b_pad != B else out


if __name__ == "__main__":
    key = jax.random.PRNGKey(0)
    kx, kw, kb = jax.random.split(key, 3)

    # Small batch consistent with the module's forward (x: [B, 5000]).
    B = 8
    x = jax.random.normal(kx, (B, IN_FEATURES), dtype=jnp.float32)

    # PyTorch nn.Linear-style uniform init, weight in [OUT, F] layout.
    bound = 1.0 / (IN_FEATURES ** 0.5)
    w = jax.random.uniform(kw, (OUT_FEATURES, IN_FEATURES),
                           minval=-bound, maxval=bound, dtype=jnp.float32)
    b = jax.random.uniform(kb, (OUT_FEATURES,),
                           minval=-bound, maxval=bound, dtype=jnp.float32)

    out = logistic_regression(x, w, b)
    out = jax.block_until_ready(out)

    # Sanity check against plain-JAX reference.
    ref = jax.nn.sigmoid(x @ w.T + b)
    assert out.shape == (B, OUT_FEATURES)
    assert jnp.allclose(out, ref, atol=1e-5, rtol=1e-5)
    print("KERNEL_OK")
</pallas_src>

<mosaic_0001>
module attributes {stable_mosaic.version = 11 : i64} {
  func.func @_logreg_kernel(%arg0: i32, %arg1: memref<8x5000xf32, #tpu.memory_space<vmem>>, %arg2: memref<2x5000xf32, #tpu.memory_space<vmem>>, %arg3: memref<1x2xf32, #tpu.memory_space<vmem>>, %arg4: memref<8x2xf32, #tpu.memory_space<vmem>>) attributes {dimension_semantics = [#tpu.dimension_semantics<parallel>], iteration_bounds = array<i64: 1>, scalar_prefetch = 0 : i64, scratch_operands = 0 : i64, tpu.core_type = #tpu.core_type<tc>, window_params = [{transform_indices = @transform_0, window_bounds = array<i64: 8, 5000>}, {pipeline_mode = #tpu.pipeline_mode<synchronous>, transform_indices = @transform_1, window_bounds = array<i64: 2, 5000>}, {pipeline_mode = #tpu.pipeline_mode<synchronous>, transform_indices = @transform_2, window_bounds = array<i64: 1, 2>}, {transform_indices = @transform_3, window_bounds = array<i64: 8, 2>}]} {
    %c0 = arith.constant 0 : index
    %c0_0 = arith.constant 0 : index
    %0 = vector.load %arg1[%c0, %c0_0] : memref<8x5000xf32, #tpu.memory_space<vmem>>, vector<8x5000xf32>
    %c0_1 = arith.constant 0 : index
    %c0_2 = arith.constant 0 : index
    %1 = vector.load %arg2[%c0_1, %c0_2] : memref<2x5000xf32, #tpu.memory_space<vmem>>, vector<2x5000xf32>
    %c0_3 = arith.constant 0 : index
    %c0_4 = arith.constant 0 : index
    %2 = vector.load %arg3[%c0_3, %c0_4] : memref<1x2xf32, #tpu.memory_space<vmem>>, vector<1x2xf32>
    %cst = arith.constant dense<0.000000e+00> : vector<8x2xf32>
    %3 = tpu.matmul %0, %1, %cst {dimension_numbers = #tpu.dot_dimension_numbers<[1], [1], [0], [0], [0, 0, 1, 0], [], []>} : vector<8x5000xf32>, vector<2x5000xf32>, vector<8x2xf32> -> vector<8x2xf32>
    %4 = vector.broadcast %2 : vector<1x2xf32> to vector<8x2xf32>
    %5 = arith.addf %3, %4 : vector<8x2xf32>
    %6 = arith.negf %5 : vector<8x2xf32>
    %7 = math.exp %6 : vector<8x2xf32>
    %cst_5 = arith.constant 1.000000e+00 : f32
    %8 = vector.broadcast %cst_5 : f32 to vector<8x2xf32>
    %9 = arith.addf %8, %7 : vector<8x2xf32>
    %10 = arith.divf %8, %9 : vector<8x2xf32>
    %c0_6 = arith.constant 0 : index
    %c0_7 = arith.constant 0 : index
    %11 = vector.load %arg4[%c0_6, %c0_7] : memref<8x2xf32, #tpu.memory_space<vmem>>, vector<8x2xf32>
    tpu.vector_store %arg4[%c0_6, %c0_7], %10 {strides = array<i32>} : memref<8x2xf32, #tpu.memory_space<vmem>>, vector<8x2xf32>,
    return
  }
  func.func @transform_0(%arg0: i32) -> (i32, i32) {
    %c0_i32 = arith.constant 0 : i32
    %c0_i32_0 = arith.constant 0 : i32
    return %arg0, %c0_i32 : i32, i32
  }
  func.func @transform_1(%arg0: i32) -> (i32, i32) {
    %c0_i32 = arith.constant 0 : i32
    %c0_i32_0 = arith.constant 0 : i32
    %c0_i32_1 = arith.constant 0 : i32
    return %c0_i32, %c0_i32_0 : i32, i32
  }
  func.func @transform_2(%arg0: i32) -> (i32, i32) {
    %c0_i32 = arith.constant 0 : i32
    %c0_i32_0 = arith.constant 0 : i32
    %c0_i32_1 = arith.constant 0 : i32
    return %c0_i32, %c0_i32_0 : i32, i32
  }
  func.func @transform_3(%arg0: i32) -> (i32, i32) {
    %c0_i32 = arith.constant 0 : i32
    %c0_i32_0 = arith.constant 0 : i32
    return %arg0, %c0_i32 : i32, i32
  }
}

</mosaic_0001>

<bundles_post_ra>
// kernel: tpu_custom_call.1
= control target key start
LH: loop header
LB: loop body
LE: loop exit
PB: predicated region body
PF: predicated region fallthrough
CT: control target
= control target key end

     0   :  { %8 = vsyncpa [#allocation3], 0  ;;  %s1918_s0 = inlined_call_operand.hbm [shape: f32[8,5000], index: 0, kind: input, shape index: {}]   ;;  %s1919_s1 = inlined_call_operand.hbm [shape: f32[2,5000], index: 1, kind: input, shape index: {}]   ;;  %s1920_s2 = inlined_call_operand.vmem [shape: f32[1,2], index: 2, kind: input, shape index: {}]   ;;  %s1921_s3 = inlined_call_operand.vmem [shape: f32[8,2], index: 3, kind: output, shape index: {}]  }
   0x1   :  { %9 = vsyncpa [#allocation5], 0  ;;  %s1841_s12 = smov [#allocation2]   ;;  %s1842_s14 = smov [#allocation4]  }
   0x2   :  { %s16_s13 = sshll.u32 %s1841_s12, 4  ;;  %s26_s15 = sshll.u32 %s1842_s14, 4  ;;  %s17_s13 = int_to_ptr.vmem [resolvable:$true] %s16_s13  ;;  %s27_s15 = int_to_ptr.vmem [resolvable:$true] %s26_s15 }
   0x3   :  { %s1793_s18 = scalar_lea.hbm %s1918_s0, 5120 }
   0x4   :  { %p1794_p0 = scmp.ne.s32.totalorder %s1918_s0, %s1793_s18  ;;  %p1797_p1 = scmp.lt.u32.totalorder %s1793_s18, %s1918_s0 }
   0x6   :  { %p1799_p2 = pnand %p1797_p1, %p1794_p0 }
   0x8   :  { %1802 = shalt.err (!%p1799_p2)
}
   0x9   :  { %s1803_s23 = scalar_lea.vmem %s17_s13, 5120  ;;  %p1808_p4 = scmp.lt.s32.totalorder %s17_s13, %s17_s13 }
   0xa   :  { %p1804_p3 = scmp.ne.s32.totalorder %s17_s13, %s1803_s23  ;;  %p1809_p5 = scmp.lt.s32.totalorder %s1803_s23, %s1803_s23 }
   0xc   :  { %p1810_p6 = por %p1809_p5, %p1808_p4 }
   0xe   :  { %p1811_p7 = pnand %p1810_p6, %p1804_p3 }
  0x10   :  { %1814 = shalt.err (!%p1811_p7)
}
  0x11   :  { %19 = dma.hbm_to_vmem [thread:$0]  %s1918_s0, 5120, %s17_s13, [#allocation3]  }
  0x12   :  { %s1815_s28 = scalar_lea.hbm %s1919_s1, 1280 }
  0x13   :  { %p1816_p8 = scmp.ne.s32.totalorder %s1919_s1, %s1815_s28  ;;  %p1819_p9 = scmp.lt.u32.totalorder %s1815_s28, %s1919_s1 }
  0x15   :  { %p1821_p10 = pnand %p1819_p9, %p1816_p8 }
  0x17   :  { %1824 = shalt.err (!%p1821_p10)
}
  0x18   :  { %s1825_s6 = scalar_lea.vmem %s27_s15, 1280  ;;  %p1830_p12 = scmp.lt.s32.totalorder %s27_s15, %s27_s15 }
  0x19   :  { %p1826_p11 = scmp.ne.s32.totalorder %s27_s15, %s1825_s6  ;;  %p1831_p13 = scmp.lt.s32.totalorder %s1825_s6, %s1825_s6 }
  0x1b   :  { %p1832_p0 = por %p1831_p13, %p1830_p12 }
  0x1d   :  { %p1833_p1 = pnand %p1832_p0, %p1826_p11 }
  0x1f   :  { %1836 = shalt.err (!%p1833_p1)
}
  0x20   :  { %29 = dma.hbm_to_vmem [thread:$0]  %s1919_s1, 1280, %s27_s15, [#allocation5]  }
  0x21   :  { %1837 = dma.done.wait [#allocation3], 5120  }
  0x22   :  { %1838 = vsyncadd [#allocation3], 4294962176 }
  0x23   :  { %1839 = dma.done.wait [#allocation5], 1280  }
  0x24   :  { %1840 = vsyncadd [#allocation5], 4294966016  ;;  %v109_v0 = vlaneseq  ;;  %v1843_v1 = vmov 1983009808   ;;  %v78_v6 = vld [vmem:[#allocation4] sm:$0xff]  ;;  %v83_v7 = vld [vmem:[#allocation4 + $0x28] sm:$0xff] }
  0x25   :  { %v107_v2 = vunpack.c.l.s4 %v1843_v1  ;;  %v39_v8 = vld [vmem:[#allocation2 + $0x8] sm:$0xff]  ;;  %v105_v9 = vcombine.high %v78_v6, %v78_v6  ;;  %v190_v11 = vcombine.high %v83_v7, %v83_v7  ;;  %v84_v19 = vld [vmem:[#allocation4 + $0x30] sm:$0xff]  ;;  %v38_v24 = vld [vmem:[#allocation2] sm:$0xff]  ;;  %vm314_vm0 = vcmask 64512  }
  0x26   :  { %v110_v3 = vshrl.u32 %v109_v0, 7  ;;  %384 = vmatprep.mubr.f32.mxu1 %v39_v8  ;;  %v59_v13 = vld [vmem:[#allocation2 + $0xa8] sm:$0xff]  ;;  %v58_v25 = vld [vmem:[#allocation2 + $0xa0] sm:$0xff]  ;;  %v41_v26 = vld [vmem:[#allocation2 + $0x18] sm:$0xff]  ;;  %v207_v31 = vcombine.high %v84_v19, %v84_v19  ;;  %vm1726_vm1 = vcmask 15360  }
  0x27   :  { %v108_v4 = vunpack.c.0.s8 %v107_v2  ;;  %1084 = vmatprep.mubr.f32.mxu0 %v59_v13  ;;  %v79_v18 = vld [vmem:[#allocation4 + $0x8] sm:$0xff]  ;;  %v61_v27 = vld [vmem:[#allocation2 + $0xb8] sm:$0xff]  ;;  %v40_v34 = vld [vmem:[#allocation2 + $0x10] sm:$0xff] }
  0x28   :  { %v122_v30 = vcombine.high %v79_v18, %v79_v18  ;;  %v60_v35 = vld [vmem:[#allocation2 + $0xb0] sm:$0xff]  ;;  %v43_v36 = vld [vmem:[#allocation2 + $0x28] sm:$0xff]  ;;  %v85_v41 = vld [vmem:[#allocation4 + $0x38] sm:$0xff] }
  0x29   :  { %v1888_v5 = vsub.s32 %v108_v4, %v110_v3  ;;  %v63_v37 = vld [vmem:[#allocation2 + $0xc8] sm:$0xff]  ;;  %v80_v40 = vld [vmem:[#allocation4 + $0x10] sm:$0xff]  ;;  %v42_v44 = vld [vmem:[#allocation2 + $0x20] sm:$0xff]  ;;  %v224_v51 = vcombine.high %v85_v41, %v85_v41 }
  0x2a   :  { %v62_v45 = vld [vmem:[#allocation2 + $0xc0] sm:$0xff]  ;;  %v45_v46 = vld [vmem:[#allocation2 + $0x38] sm:$0xff]  ;;  %v139_v50 = vcombine.high %v80_v40, %v80_v40  ;;  %v44_v54 = vld [vmem:[#allocation2 + $0x30] sm:$0xff] }
  0x2b   :  { %v112_v10 = vrot.slane %v78_v6, %v1888_v5  ;;  %v197_v12 = vrot.slane %v83_v7, %v1888_v5  ;;  %v119_v16 = vrot.slane %v105_v9, %v1888_v5  ;;  %v204_v17 = vrot.slane %v190_v11, %v1888_v5  ;;  %v65_v47 = vld [vmem:[#allocation2 + $0xd8] sm:$0xff]  ;;  %v64_v55 = vld [vmem:[#allocation2 + $0xd0] sm:$0xff]  ;;  %v47_v56 = vld [vmem:[#allocation2 + $0x48] sm:$0xff] }
  0x2c   :  { %v129_v20 = vrot.slane %v79_v18, %v1888_v5  ;;  %v214_v21 = vrot.slane %v84_v19, %v1888_v5  ;;  %v136_v32 = vrot.slane %v122_v30, %v1888_v5  ;;  %v221_v33 = vrot.slane %v207_v31, %v1888_v5  ;;  %v67_v57 = vld [vmem:[#allocation2 + $0xe8] sm:$0xff]  ;;  %v81_v60 = vld [vmem:[#allocation4 + $0x18] sm:$0xff]  ;;  %v86_v61 = vld [vmem:[#allocation4 + $0x40] sm:$0xff] }
  0x2d   :  { %v120_v14 = vcombine.high %v112_v10, %v112_v10  ;;  %v205_v15 = vcombine.high %v197_v12, %v197_v12  ;;  %v121_v22 = vcombine.high %v119_v16, %v119_v16  ;;  %v206_v23 = vcombine.high %v204_v17, %v204_v17  ;;  %v46_v0 = vld [vmem:[#allocation2 + $0x40] sm:$0xff]  ;;  %v49_v2 = vld [vmem:[#allocation2 + $0x58] sm:$0xff]  ;;  %v48_v11 = vld [vmem:[#allocation2 + $0x50] sm:$0xff] }
  0x2e   :  { %v137_v28 = vcombine.high %v129_v20, %v129_v20  ;;  %v222_v29 = vcombine.high %v214_v21, %v214_v21  ;;  %v138_v38 = vcombine.high %v136_v32, %v136_v32  ;;  %v223_v39 = vcombine.high %v221_v33, %v221_v33  ;;  %v66_v1 = vld [vmem:[#allocation2 + $0xe0] sm:$0xff]  ;;  %v69_v3 = vld [vmem:[#allocation2 + $0xf8] sm:$0xff]  ;;  %v51_v13 = vld [vmem:[#allocation2 + $0x68] sm:$0xff] }
  0x2f   :  { %320 = vmatprep.subr.mxu1 %v120_v14  ;;  %1020 = vmatprep.subr.mxu0 %v205_v15  ;;  %v146_v42 = vrot.slane %v80_v40, %v1888_v5  ;;  %v231_v43 = vrot.slane %v85_v41, %v1888_v5  ;;  %v153_v52 = vrot.slane %v139_v50, %v1888_v5  ;;  %v71_v14 = vld [vmem:[#allocation2 + $0x108] sm:$0xff]  ;;  %v52_v31 = vld [vmem:[#allocation2 + $0x70] sm:$0xff] }
  0x30   :  { %321 = vmatpush1.xpose.msra.mxu1 %v112_v10  ;;  %1021 = vmatpush1.xpose.msra.mxu0 %v197_v12  ;;  %v238_v53 = vrot.slane %v224_v51, %v1888_v5  ;;  %v163_v62 = vrot.slane %v81_v60, %v1888_v5  ;;  %v248_v63 = vrot.slane %v86_v61, %v1888_v5  ;;  %v68_v12 = vld [vmem:[#allocation2 + $0xf0] sm:$0xff]  ;;  %v87_v18 = vld [vmem:[#allocation4 + $0x48] sm:$0xff] }
  0x31   :  { %390 = vmatprep.subr.mxu1 %v121_v22  ;;  %1090 = vmatprep.subr.mxu0 %v206_v23  ;;  %v154_v48 = vcombine.high %v146_v42, %v146_v42  ;;  %v239_v49 = vcombine.high %v231_v43, %v231_v43  ;;  %v155_v58 = vcombine.high %v153_v52, %v153_v52  ;;  %v70_v22 = vld [vmem:[#allocation2 + $0x100] sm:$0xff]  ;;  %v53_v23 = vld [vmem:[#allocation2 + $0x78] sm:$0xff]  ;;  %v56_v40 = vld [vmem:[#allocation2 + $0x90] sm:$0xff] }
  0x32   :  { %v240_v59 = vcombine.high %v238_v53, %v238_v53  ;;  %v171_v4 = vcombine.high %v163_v62, %v163_v62  ;;  %v256_v6 = vcombine.high %v248_v63, %v248_v63  ;;  %v156_v7 = vcombine.high %v81_v60, %v81_v60  ;;  %v76_v41 = vld [vmem:[#allocation2 + $0x130] sm:$0xff] }
  0x33   :  { %385 = vmatmul.mubr.f32.vlgmr.msra.gmra.mrb[0].mxu1 %v38_v24  ;;  %1085 = vmatmul.mubr.f32.vlgmr.msra.gmra.mrb[0].mxu0 %v58_v25  ;;  %v241_v8 = vcombine.high %v86_v61, %v86_v61  ;;  %v73_v24 = vld [vmem:[#allocation2 + $0x118] sm:$0xff] }
  0x34   :  { %391 = vmatpush1.xpose.msra.mxu1 %v119_v16  ;;  %1091 = vmatpush1.xpose.msra.mxu0 %v204_v17  ;;  %v170_v9 = vrot.slane %v156_v7, %v1888_v5  ;;  %v82_v17 = vld [vmem:[#allocation4 + $0x20] sm:$0xff] }
  0x35   :  { %454 = vmatprep.mubr.f32.mxu1 %v41_v26  ;;  %1154 = vmatprep.mubr.f32.mxu0 %v61_v27  ;;  %v255_v10 = vrot.slane %v241_v8, %v1888_v5  ;;  %v180_v19 = vrot.slane %v82_v17, %v1888_v5  ;;  %v258_v26 = vcombine.high %v87_v18, %v87_v18 }
  0x36   :  { %460 = vmatprep.subr.mxu1 %v137_v28  ;;  %1160 = vmatprep.subr.mxu0 %v222_v29  ;;  %v172_v15 = vcombine.high %v170_v9, %v170_v9  ;;  %v173_v28 = vcombine.high %v82_v17, %v82_v17 }
  0x37   :  { %v257_v16 = vcombine.high %v255_v10, %v255_v10  ;;  %v188_v25 = vcombine.high %v180_v19, %v180_v19  ;;  %v272_v30 = vrot.slane %v258_v26, %v1888_v5 }
  0x38   :  { %v187_v29 = vrot.slane %v173_v28, %v1888_v5 }
  0x3b   :  { %455 = vmatmul.mubr.f32.vlgmr.msra.gmra.mrb[0].mxu1 %v40_v34  ;;  %1155 = vmatmul.mubr.f32.vlgmr.msra.gmra.mrb[0].mxu0 %v60_v35  ;;  %v75_v34 = vld [vmem:[#allocation2 + $0x128] sm:$0xff]  ;;  %v189_v35 = vcombine.high %v187_v29, %v187_v29 }
  0x3c   :  { %461 = vmatpush1.xpose.msra.mxu1 %v129_v20  ;;  %1161 = vmatpush1.xpose.msra.mxu0 %v214_v21  ;;  %v265_v20 = vrot.slane %v87_v18, %v1888_v5  ;;  %v50_v21 = vld [vmem:[#allocation2 + $0x60] sm:$0xff]  ;;  %v77_v5 = vld [vmem:[#allocation2 + $0x138] sm:$0xff] }
  0x3d   :  { %524 = vmatprep.mubr.f32.mxu1 %v43_v36  ;;  %1224 = vmatprep.mubr.f32.mxu0 %v63_v37  ;;  %v274_v36 = vcombine.high %v272_v30, %v272_v30  ;;  %v54_v37 = vld [vmem:[#allocation2 + $0x80] sm:$0xff] }
  0x3e   :  { %530 = vmatprep.subr.mxu1 %v138_v38  ;;  %1230 = vmatprep.subr.mxu0 %v223_v39  ;;  %v273_v27 = vcombine.high %v265_v20, %v265_v20  ;;  %v74_v38 = vld [vmem:[#allocation2 + $0x120] sm:$0xff]  ;;  %v57_v39 = vld [vmem:[#allocation2 + $0x98] sm:$0xff] }
  0x43   :  { %525 = vmatmul.mubr.f32.vlgmr.msra.gmra.mrb[0].mxu1 %v42_v44  ;;  %1225 = vmatmul.mubr.f32.vlgmr.msra.gmra.mrb[0].mxu0 %v62_v45 }
  0x44   :  { %531 = vmatpush1.xpose.msra.mxu1 %v136_v32  ;;  %1231 = vmatpush1.xpose.msra.mxu0 %v221_v33  ;;  %v72_v32 = vld [vmem:[#allocation2 + $0x110] sm:$0xff]  ;;  %v55_v33 = vld [vmem:[#allocation2 + $0x88] sm:$0xff] }
  0x45   :  { %594 = vmatprep.mubr.f32.mxu1 %v45_v46  ;;  %1294 = vmatprep.mubr.f32.mxu0 %v65_v47 }
  0x46   :  { %600 = vmatprep.subr.mxu1 %v154_v48  ;;  %1300 = vmatprep.subr.mxu0 %v239_v49 }
  0x4b   :  { %595 = vmatmul.mubr.f32.vlgmr.msra.gmra.mrb[0].mxu1 %v44_v54  ;;  %1295 = vmatmul.mubr.f32.vlgmr.msra.gmra.mrb[0].mxu0 %v64_v55 }
  0x4c   :  { %601 = vmatpush1.xpose.msra.mxu1 %v146_v42  ;;  %1301 = vmatpush1.xpose.msra.mxu0 %v231_v43  ;;  %v1734_v42 = vld [vmem:[%s1920_s2] ss:$0 sm:$0xff] }
  0x4d   :  { %664 = vmatprep.mubr.f32.mxu1 %v47_v56  ;;  %1364 = vmatprep.mubr.f32.mxu0 %v67_v57 }
  0x4e   :  { %670 = vmatprep.subr.mxu1 %v155_v58  ;;  %1370 = vmatprep.subr.mxu0 %v240_v59 }
  0x53   :  { %665 = vmatmul.mubr.f32.vlgmr.msra.gmra.mrb[0].mxu1 %v46_v0  ;;  %1365 = vmatmul.mubr.f32.vlgmr.msra.gmra.mrb[0].mxu0 %v66_v1 }
  0x54   :  { %671 = vmatpush1.xpose.msra.mxu1 %v153_v52  ;;  %1371 = vmatpush1.xpose.msra.mxu0 %v238_v53 }
  0x55   :  { %734 = vmatprep.mubr.f32.mxu1 %v49_v2  ;;  %1434 = vmatprep.mubr.f32.mxu0 %v69_v3 }
  0x56   :  { %740 = vmatprep.subr.mxu1 %v171_v4  ;;  %1440 = vmatprep.subr.mxu0 %v256_v6 }
  0x5b   :  { %735 = vmatmul.mubr.f32.vlgmr.msra.gmra.mrb[0].mxu1 %v48_v11  ;;  %1435 = vmatmul.mubr.f32.vlgmr.msra.gmra.mrb[0].mxu0 %v68_v12 }
  0x5c   :  { %741 = vmatpush1.xpose.msra.mxu1 %v163_v62  ;;  %1441 = vmatpush1.xpose.msra.mxu0 %v248_v63 }
  0x5d   :  { %804 = vmatprep.mubr.f32.mxu1 %v51_v13  ;;  %1504 = vmatprep.mubr.f32.mxu0 %v71_v14 }
  0x5e   :  { %810 = vmatprep.subr.mxu1 %v172_v15  ;;  %1510 = vmatprep.subr.mxu0 %v257_v16 }
  0x63   :  { %805 = vmatmul.mubr.f32.vlgmr.msra.gmra.mrb[0].mxu1 %v50_v21  ;;  %1505 = vmatmul.mubr.f32.vlgmr.msra.gmra.mrb[0].mxu0 %v70_v22 }
  0x64   :  { %811 = vmatpush1.xpose.msra.mxu1 %v170_v9  ;;  %1511 = vmatpush1.xpose.msra.mxu0 %v255_v10 }
  0x65   :  { %874 = vmatprep.mubr.f32.mxu1 %v53_v23  ;;  %1574 = vmatprep.mubr.f32.mxu0 %v73_v24 }
  0x66   :  { %880 = vmatprep.subr.mxu1 %v188_v25  ;;  %1580 = vmatprep.subr.mxu0 %v273_v27 }
  0x6b   :  { %875 = vmatmul.mubr.f32.vlgmr.msra.gmra.mrb[0].mxu1 %v52_v31  ;;  %1575 = vmatmul.mubr.f32.vlgmr.msra.gmra.mrb[0].mxu0 %v72_v32 }
  0x6c   :  { %881 = vmatpush1.xpose.msra.mxu1 %v180_v19  ;;  %1581 = vmatpush1.xpose.msra.mxu0 %v265_v20 }
  0x6d   :  { %944 = vmatprep.mubr.f32.mxu1 %v55_v33  ;;  %1644 = vmatprep.mubr.f32.mxu0 %v75_v34 }
  0x6e   :  { %950 = vmatprep.subr.mxu1 %v189_v35  ;;  %1735 = vmatprep.subr.msk.mxu0 %vm314_vm0, %v274_v36 }
  0x73   :  { %945 = vmatmul.mubr.f32.vlgmr.msra.gmra.mrb[0].mxu1 %v54_v37  ;;  %1645 = vmatmul.mubr.f32.vlgmr.msra.gmra.mrb[0].mxu0 %v74_v38 }
  0x74   :  { %951 = vmatpush1.xpose.msra.mxu1 %v187_v29  ;;  %1651 = vmatpush1.xpose.msra.mxu0 %v272_v30 }
  0x75   :  { %1014 = vmatprep.mubr.f32.mxu1 %v57_v39  ;;  %1736 = vmatprep.mubr.msk.f32.mxu0 %vm314_vm0, %v77_v5 }
  0x7b   :  { %1015 = vmatmul.mubr.f32.vlgmr.msra.gmra.mrb[0].mxu1 %v56_v40  ;;  %1715 = vmatmul.mubr.f32.vlgmr.msra.gmra.mrb[0].mxu0 %v76_v41 }
 0x14e   :  { %v1016_v43 = vpop.f32.mrb[0].mxu1  ;;  %v1716_v44 = vpop.f32.mrb[0].mxu0 }
 0x14f   :  { %v1738_v45 = vadd.f32 %v1734_v42, %v1016_v43  ;;  %v1018_v46 = vpop.f32.mrb[1].mxu1  ;;  %v1718_v47 = vpop.f32.mrb[1].mxu0 }
 0x151   :  { %v1739_v48 = vadd.f32 %v1738_v45, %v1716_v44 }
 0x153   :  { %v1737_v49 = vmul.f32 -1.442695, %v1739_v48 }
 0x155   :  { %1789 = vpow2.f32 %v1737_v49 }
 0x15f   :  { %v1790_v50 = vpop.eup %1789 }
 0x160   :  { %v1723_v51 = vadd.f32 1.0, %v1790_v50 }
 0x162   :  { %1791 = vrcp.f32 %v1723_v51 }
 0x16c   :  { %v1792_v52 = vpop.eup %1791 }
 0x16d   :  { %1727 = vst.msk [vmem:[%s1921_s3] sm:$0xff] %vm1726_vm1, %v1792_v52 }
 0x16e   :  { %1732 = vsyncpa [#allocation3], 1 }
 0x16f   :  { %1733 = vsyncpa [#allocation5], 1 }

</bundles_post_ra>
